<compile_context>
chip_gen: v5e
topology: v5e:2x2
jax: 0.10.0
libtpu: 0.0.40
codegen_flags: <defaults>
</compile_context>

<pallas_src>
import jax
import jax.numpy as jnp
from jax.experimental import pallas as pl
from jax.experimental.pallas import tpu as pltpu


def cat4_tanh_kernel(x_ref, o_ref):
    """x_ref: (TB, CW); o_ref: (TB, 4*CW).  out[:, r*CW:(r+1)*CW] = tanh(x)."""
    cw = x_ref.shape[1]
    t = jnp.tanh(x_ref[...]).astype(o_ref.dtype)
    # Four contiguous lane-slab stores of the same tile; slab offsets are
    # static so the compiler sees fully-known, unmasked vst when CW % 128 == 0.
    for r in range(4):
        o_ref[:, pl.ds(r * cw, cw)] = t


def _choose_row_tile(B, CW, dsize):
    """Pick the row tile TB for the (B, CW) -> (B, 4*CW) elementwise kernel."""
    # Sublane packing granularity: f32 -> 8, bf16 -> 16, int8/fp8 -> 32.
    pack = max(8, (8 * 4) // dsize)
    cw_pad = pl.cdiv(max(CW, 1), 128) * 128
    # Per-step VMEM bytes per row: input row + 4x output row, double-buffered.
    per_row = 5 * cw_pad * dsize * 2
    budget = 2 * 1024 * 1024  # ~2 MiB/step keeps DMA-in/compute/DMA-out overlapped
    tb = (budget // per_row) // pack * pack
    tb = max(tb, pack)
    if tb >= B:
        return B
    steps = pl.cdiv(B, tb)
    # Aim for >= 8 steps (>= 4 per v7x TensorCore) when the row count permits.
    if steps < 8:
        steps = min(8, pl.cdiv(B, pack))
    # Even step count so v7x's two TensorCores split the parallel axis evenly.
    if steps % 2 == 1:
        steps += 1
    tb = max(pack, pl.cdiv(pl.cdiv(B, steps), pack) * pack)
    if tb >= B:
        return B
    return tb


def model_forward(x):
    B = x.shape[0]
    CW = 1
    for d in x.shape[1:]:
        CW *= d
    x2d = x.reshape(B, CW)
    total = B * CW
    dsize = jnp.dtype(x.dtype).itemsize

    # Tiny inputs: launch + per-step overhead dominates until the mem-bound
    # transfer (5x total bytes) reaches a few microseconds.
    if total * 5 * dsize < 2 * 1024 * 1024:
        return jnp.tile(jnp.tanh(x2d), (1, 4)).reshape(-1)

    TB = _choose_row_tile(B, CW, dsize)
    grid = (pl.cdiv(B, TB),)

    # VMEM limit from the actual double-buffered tile footprint (+2x headroom
    # for compiler internal scratch), clamped well under v7x's scoped VMEM.
    cw_pad = pl.cdiv(CW, 128) * 128
    out_pad = pl.cdiv(4 * CW, 128) * 128
    tile_bytes = 2 * TB * (cw_pad + out_pad) * dsize
    vmem_limit = min(32 * 1024 * 1024, max(4 * 1024 * 1024, 2 * tile_bytes))

    out = pl.pallas_call(
        cat4_tanh_kernel,
        out_shape=jax.ShapeDtypeStruct((B, 4 * CW), x.dtype),
        grid_spec=pltpu.PrefetchScalarGridSpec(
            num_scalar_prefetch=0,
            grid=grid,
            # Input: lane-dense (TB, CW); last dim equals the full array dim.
            in_specs=[pl.BlockSpec((TB, CW), lambda i: (i, 0))],
            # Output: lane-dense (TB, 4*CW); last dim equals the full array dim.
            out_specs=pl.BlockSpec((TB, 4 * CW), lambda i: (i, 0)),
        ),
        compiler_params=pltpu.CompilerParams(
            dimension_semantics=("parallel",),
            vmem_limit_bytes=int(vmem_limit),
        ),
        cost_estimate=pl.CostEstimate(
            flops=0,
            transcendentals=total,
            bytes_accessed=5 * total * dsize,  # 1x read + 4x write, no padding
        ),
    )(x2d)

    # Row-major flatten of (B, 4*CW) == flatten of cat((x,)*4, dim=1): free.
    return out.reshape(-1)


if __name__ == "__main__":
    key = jax.random.PRNGKey(0)
    k1, k2, k3 = jax.random.split(key, 3)

    # 1) Spec-sized input (2, 3, 4): tiny -> fused plain-JAX fallback path.
    x_small = jax.random.normal(k1, (2, 3, 4), dtype=jnp.float32)
    y_small = jax.block_until_ready(model_forward(x_small))
    ref_small = jnp.tanh(jnp.concatenate([x_small] * 4, axis=1)).reshape(-1)
    assert y_small.shape == ref_small.shape
    assert jnp.allclose(y_small, ref_small, atol=1e-6, rtol=1e-6)

    # 2) Larger f32 input exercising the Pallas path: multi-step row grid with
    #    a partial (non-divisible) edge block (2048 % 176 != 0).
    x_big = jax.random.normal(k2, (2048, 8, 32), dtype=jnp.float32)
    y_big = jax.block_until_ready(model_forward(x_big))
    ref_big = jnp.tanh(jnp.concatenate([x_big] * 4, axis=1)).reshape(-1)
    assert y_big.shape == ref_big.shape
    assert jnp.allclose(y_big, ref_big, atol=1e-6, rtol=1e-6)

    # 3) bf16 input exercising the sublane-packing-aware tile rounding.
    x_bf16 = jax.random.normal(k3, (512, 16, 32), dtype=jnp.bfloat16)
    y_bf16 = jax.block_until_ready(model_forward(x_bf16))
    ref_bf16 = jnp.tanh(jnp.concatenate([x_bf16] * 4, axis=1)).reshape(-1)
    assert y_bf16.shape == ref_bf16.shape
    assert jnp.allclose(y_bf16.astype(jnp.float32), ref_bf16.astype(jnp.float32),
                        atol=1e-2, rtol=1e-2)

    print("KERNEL_OK")
</pallas_src>

<mosaic_0001>
module attributes {stable_mosaic.version = 11 : i64} {
  func.func @cat4_tanh_kernel(%arg0: i32, %arg1: memref<176x256xf32, #tpu.memory_space<vmem>>, %arg2: memref<176x1024xf32, #tpu.memory_space<vmem>>) attributes {dimension_semantics = [#tpu.dimension_semantics<parallel>], iteration_bounds = array<i64: 12>, scalar_prefetch = 0 : i64, scratch_operands = 0 : i64, tpu.core_type = #tpu.core_type<tc>, window_params = [{transform_indices = @transform_0, window_bounds = array<i64: 176, 256>}, {transform_indices = @transform_1, window_bounds = array<i64: 176, 1024>}]} {
    %c0 = arith.constant 0 : index
    %c0_0 = arith.constant 0 : index
    %0 = vector.load %arg1[%c0, %c0_0] : memref<176x256xf32, #tpu.memory_space<vmem>>, vector<176x256xf32>
    %1 = math.tanh %0 : vector<176x256xf32>
    %c0_1 = arith.constant 0 : index
    %c0_2 = arith.constant 0 : index
    %2 = vector.load %arg2[%c0_1, %c0_2] : memref<176x1024xf32, #tpu.memory_space<vmem>>, vector<176x256xf32>
    tpu.vector_store %arg2[%c0_1, %c0_2], %1 {strides = array<i32>} : memref<176x1024xf32, #tpu.memory_space<vmem>>, vector<176x256xf32>,
    %c0_3 = arith.constant 0 : index
    %c256 = arith.constant 256 : index
    %3 = vector.load %arg2[%c0_3, %c256] : memref<176x1024xf32, #tpu.memory_space<vmem>>, vector<176x256xf32>
    tpu.vector_store %arg2[%c0_3, %c256], %1 {strides = array<i32>} : memref<176x1024xf32, #tpu.memory_space<vmem>>, vector<176x256xf32>,
    %c0_4 = arith.constant 0 : index
    %c512 = arith.constant 512 : index
    %4 = vector.load %arg2[%c0_4, %c512] : memref<176x1024xf32, #tpu.memory_space<vmem>>, vector<176x256xf32>
    tpu.vector_store %arg2[%c0_4, %c512], %1 {strides = array<i32>} : memref<176x1024xf32, #tpu.memory_space<vmem>>, vector<176x256xf32>,
    %c0_5 = arith.constant 0 : index
    %c768 = arith.constant 768 : index
    %5 = vector.load %arg2[%c0_5, %c768] : memref<176x1024xf32, #tpu.memory_space<vmem>>, vector<176x256xf32>
    tpu.vector_store %arg2[%c0_5, %c768], %1 {strides = array<i32>} : memref<176x1024xf32, #tpu.memory_space<vmem>>, vector<176x256xf32>,
    return
  }
  func.func @transform_0(%arg0: i32) -> (i32, i32) {
    %c0_i32 = arith.constant 0 : i32
    %c0_i32_0 = arith.constant 0 : i32
    return %arg0, %c0_i32 : i32, i32
  }
  func.func @transform_1(%arg0: i32) -> (i32, i32) {
    %c0_i32 = arith.constant 0 : i32
    %c0_i32_0 = arith.constant 0 : i32
    return %arg0, %c0_i32 : i32, i32
  }
}

</mosaic_0001>

<bundles_post_ra>
// kernel: tpu_custom_call.1
= control target key start
LH: loop header
LB: loop body
LE: loop exit
PB: predicated region body
PF: predicated region fallthrough
CT: control target
= control target key end

     0   :  { %6 = vsyncpa [#allocation3], 0  ;;  %s1212_s0 = inlined_call_operand.hbm [shape: f32[2048,256], index: 0, kind: input, shape index: {}]   ;;  %s1213_s1 = inlined_call_operand.hbm [shape: f32[2048,1024], index: 1, kind: output, shape index: {}]  }
   0x1   :  { %8 = vsyncpa [#allocation3 + $0x1], 0 }
   0x2   :  { %9 = vsyncpa [#allocation4], 0 }
   0x3   :  { %11 = vsyncpa [#allocation4 + $0x1], 0  ;;  %s816_s6 = smov 0   ;;  %s818_s7 = smov 0  }
   0x4   :  { %s820_s8 = smov 0   ;;  %s822_s9 = smov 0  }
   0x5 LB: > { %s837_s10 = sadd.s32 4294967295, %s798_s9   ;;  %s520_s11 = sadd.s32 4294967294, %s798_s9   ;;  %s798_s9 = sphi %s822_s9, %s1222_s9   ;;  %s794_s8 = sphi %s820_s8, %s1221_s8   ;;  %s790_s7 = sphi %s818_s7, %s1220_s7   ;;  %s786_s6 = sphi %s816_s6, %s1219_s6  }
   0x6   : > { %s841_s12 = sadd.s32 1, %s798_s9   ;;  %s24_s13 = sadd.s32 1, %s794_s8 }
   0x7   : > { %s21_s14 = ssub.s32 %s798_s9, %s841_s12  ;;  %p31_p0 = scmp.ne.s32.totalorder %s794_s8, %s790_s7 }
   0x8   : > { %p22_p1 = scmp.eq.s32.totalorder %s21_s14, 0  ;;  %p32_p2 = scmp.eq.s32.totalorder %s798_s9, 0 }
   0x9   : > { %p37_p3 = scmp.ne.s32.totalorder %s790_s7, %s786_s6  ;;  %p38_p4 = scmp.eq.s32.totalorder %s837_s10, 0 }
   0xa   : > { %s853_s15 = scalar_select %p22_p1, %s794_s8, %s24_s13  }
   0xb   : > { %p33_p5 = por %p32_p2, %p31_p0  ;;  %p855_p6 = por %p38_p4, %p37_p3 }
   0xc   : > { %p61_p7 = scmp.eq.s32.totalorder %s837_s10, 11  ;;  %p67_p8 = scmp.eq.s32.totalorder %s520_s11, 11 }
   0xd   : > { %p522_p11 = scmp.ge.s32.totalorder %s798_s9, 12 }
   0xe   : > { %p860_p9 = por %p61_p7, %p31_p0  ;;  %p864_p10 = por %p67_p8, %p37_p3 }
   0xf   : > { %83 = sbr.rel (%p522_p11) target bundleno = 58 (0x3a), region = 16 }
  0x14   : > { %86 = sbr.rel (!%p33_p5) target bundleno = 58 (0x3a), region = 20  ;;  %s87_s19 = sand.u32 (%p33_p5), 1, %s794_s8  }
  0x15   : > { %s92_s20 = smul.u32 (%p33_p5), 22, %s798_s9  ;;  %s874_s26 = scalar_lea.sflag (%p33_p5), [#allocation3], %s87_s19 }
  0x16   : > { %s548_s21 = smul.u32 (%p33_p5), 352, %s87_s19 }
  0x17   : > { %s93_s22 = ssub.s32 (%p33_p5), 256, %s92_s20 }
  0x18   : > { %p94_p12 = scmp.lt.s32.totalorder (%p33_p5), %s93_s22, 22  ;;  %s91_s27 = scalar_lea.vmem (%p33_p5), [#allocation2], %s548_s21 }
  0x1a   : > { %s1224_s22 = smov (!%p94_p12, %s93_s22), 22 }
  0x1b   : > { %s540_s23 = sshll.u32 %s1224_s22, 4 }
  0x1c   : > { %s98_s24 = ssub.s32 352, %s540_s23 }
  0x1d   : > { %s99_s25 = sshll.u32 %s98_s24, 4 }
  0x1e   : > { %100 = vsyncadd %s874_s26, %s99_s25  ;;  %p877_p13 = scmp.ne.s32.totalorder %s540_s23, 0  ;;  %s546_s29 = smul.u32 352, %s798_s9 }
  0x1f   : > { %s882_s30 = sshll.u32 %s91_s27, 4  ;;  %s529_s2 = sshll.u32 %s1224_s22, 8  ;;  %s109_s30 = int_to_ptr.vmem [resolvable:$true] %s882_s30 }
  0x20   : > { %s104_s5 = scalar_lea.hbm %s1212_s0, %s546_s29  ;;  %s684_s14 = sshrl.u32 %s529_s2, 4 }
  0x21   : > { %s106_s11 = sshll.u32 %s104_s5, 4  ;;  %s693_s23 = scalar_lea.hbm %s1212_s0, 4096  ;;  %s889_s11 = int_to_ptr.hbm [resolvable:$true] %s106_s11 }
  0x22   : > { %s682_s13 = sshra.s32 %s889_s11, 4  ;;  %s683_s13 = int_to_ptr.hbm [resolvable:$true] %s682_s13 }
  0x23   : > { %s689_s19 = scalar_lea.hbm %s683_s13, %s684_s14  ;;  %p694_p3 = scmp.lt.s32.totalorder %s683_s13, %s1212_s0 }
  0x24   : > { %p690_p0 = scmp.ne.s32.totalorder %s683_s13, %s689_s19  ;;  %p695_p4 = scmp.lt.s32.totalorder %s693_s23, %s689_s19 }
  0x26   : > { %p691_p1 = pnand %p690_p0, %p877_p13  ;;  %p696_p5 = por %p695_p4, %p694_p3 }
  0x28   : > { %p692_p2 = pneg %p691_p1 }
  0x2a   : > { %p697_p7 = pnand %p696_p5, %p692_p2 }
  0x2c   : > { %700 = shalt.err (!%p697_p7)
}
  0x2d   : > { %s701_s27 = sshra.s32 %s109_s30, 4  ;;  %s800_s3 = smov [#allocation2]   ;;  %s702_s27 = int_to_ptr.vmem [resolvable:$true] %s701_s27 }
  0x2e   : > { %s708_s29 = scalar_lea.vmem %s702_s27, %s684_s14  ;;  %s712_s4 = scalar_lea.vmem %s800_s3, 704 }
  0x2f   : > { %p709_p8 = scmp.ne.s32.totalorder %s702_s27, %s708_s29  ;;  %p714_p0 = scmp.lt.s32.totalorder %s712_s4, %s708_s29 }
  0x31   : > { %p710_p11 = pnand %p709_p8, %p877_p13 }
  0x33   : > { %p711_p12 = pneg %p710_p11 }
  0x35   : > { %p716_p1 = pnand %p714_p0, %p711_p12 }
  0x37   : > { %719 = shalt.err (!%p716_p1)
}
  0x38   : > { %s801_s5 = smov 256   ;;  %s802_s13 = smov 16  }
  0x39   : > { %114 = dma.hbm_to_vmem [thread:$0]  (%p877_p13), %s889_s11, %s529_s2, %s109_s30, %s874_s26, %s801_s5, %s801_s5, %s802_s13  }
  0x3a PF: > { %p530_p2 = scmp.ge.s32.totalorder %s798_s9, 1  ;;  %p116_p3 = scmp.lt.s32.totalorder %s798_s9, 13 }
  0x3c   : > { %p117_p4 = pnand %p530_p2, %p116_p3 }
  0x3d   : > { %s917_s14 = sand.u32 (!%p117_p4), 1, %s790_s7  }
  0x3e   : > { %120 = sbr.rel (%p117_p4) target bundleno = 283 (0x11b), region = 24  ;;  %s123_s20 = scalar_lea.sflag (!%p117_p4), [#allocation3], %s917_s14 }
  0x3f   : > { %s549_s19 = smul.u32 (!%p117_p4), 352, %s917_s14 }
  0x41   : > { %s921_s28 = scalar_lea.vmem (!%p117_p4), [#allocation2], %s549_s19 }
  0x43   : > { %777 = dma.done.wait (%p855_p6), %s123_s20, 5632  }
  0x44   : > { %779 = vsyncadd (%p855_p6), %s123_s20, 4294961664  ;;  %v158_v0 = vld [vmem:[%s921_s28] sm:$0xff]  ;;  %v159_v1 = vld [vmem:[%s921_s28 + $0x8] sm:$0xff]  ;;  %s550_s22 = smul.u32 1408, %s917_s14  ;;  %s423_s16 = scalar_lea.sflag [#allocation4], %s917_s14 }
  0x45   : > { %594 = vtanh.f32 %v158_v0  ;;  %v160_v2 = vld [vmem:[%s921_s28 + $0x10] sm:$0xff]  ;;  %v161_v4 = vld [vmem:[%s921_s28 + $0x18] sm:$0xff]  ;;  %v162_v6 = vld [vmem:[%s921_s28 + $0x20] sm:$0xff]  ;;  %s430_s30 = smul.u32 (%p860_p9), 22, %s837_s10 }
  0x46   : > { %596 = vtanh.f32 %v159_v1  ;;  %s931_s26 = scalar_lea.vmem [#allocation5], %s550_s22  ;;  %v163_v8 = vld [vmem:[%s921_s28 + $0x28] sm:$0xff]  ;;  %v164_v10 = vld [vmem:[%s921_s28 + $0x30] sm:$0xff]  ;;  %v165_v12 = vld [vmem:[%s921_s28 + $0x38] sm:$0xff] }
  0x47   : > { %598 = vtanh.f32 %v160_v2  ;;  %v166_v14 = vld [vmem:[%s921_s28 + $0x40] sm:$0xff]  ;;  %v167_v16 = vld [vmem:[%s921_s28 + $0x48] sm:$0xff]  ;;  %v168_v18 = vld [vmem:[%s921_s28 + $0x50] sm:$0xff]  ;;  %s431_s2 = ssub.s32 (%p860_p9), 256, %s430_s30 }
  0x48   : > { %600 = vtanh.f32 %v161_v4  ;;  %v169_v20 = vld [vmem:[%s921_s28 + $0x58] sm:$0xff]  ;;  %v170_v22 = vld [vmem:[%s921_s28 + $0x60] sm:$0xff]  ;;  %v171_v24 = vld [vmem:[%s921_s28 + $0x68] sm:$0xff]  ;;  %p432_p6 = scmp.lt.s32.totalorder (%p860_p9), %s431_s2, 22 }
  0x49   : > { %602 = vtanh.f32 %v162_v6  ;;  %v172_v26 = vld [vmem:[%s921_s28 + $0x70] sm:$0xff]  ;;  %v173_v28 = vld [vmem:[%s921_s28 + $0x78] sm:$0xff]  ;;  %v174_v30 = vld [vmem:[%s921_s28 + $0x80] sm:$0xff] }
  0x4a   : > { %604 = vtanh.f32 %v163_v8  ;;  %v175_v32 = vld [vmem:[%s921_s28 + $0x88] sm:$0xff]  ;;  %v176_v34 = vld [vmem:[%s921_s28 + $0x90] sm:$0xff]  ;;  %v177_v36 = vld [vmem:[%s921_s28 + $0x98] sm:$0xff] }
  0x4b   : > { %v595_v3 = vpop.eup %594  ;;  %606 = vtanh.f32 %v164_v10  ;;  %v178_v38 = vld [vmem:[%s921_s28 + $0xa0] sm:$0xff]  ;;  %v179_v40 = vld [vmem:[%s921_s28 + $0xa8] sm:$0xff]  ;;  %v180_v42 = vld [vmem:[%s921_s28 + $0xb0] sm:$0xff] }
  0x4c   : > { %246 = vst [vmem:[%s931_s26] sm:$0xff] %v595_v3  ;;  %v597_v5 = vpop.eup %596  ;;  %608 = vtanh.f32 %v165_v12  ;;  %v181_v44 = vld [vmem:[%s921_s28 + $0xb8] sm:$0xff]  ;;  %v182_v46 = vld [vmem:[%s921_s28 + $0xc0] sm:$0xff]  ;;  %v183_v48 = vld [vmem:[%s921_s28 + $0xc8] sm:$0xff] }
  0x4d   : > { %290 = vst [vmem:[%s931_s26 + $0x10] sm:$0xff] %v595_v3  ;;  %v599_v7 = vpop.eup %598  ;;  %610 = vtanh.f32 %v166_v14  ;;  %v184_v50 = vld [vmem:[%s921_s28 + $0xd0] sm:$0xff]  ;;  %v185_v52 = vld [vmem:[%s921_s28 + $0xd8] sm:$0xff]  ;;  %v186_v54 = vld [vmem:[%s921_s28 + $0xe0] sm:$0xff] }
  0x4e   : > { %334 = vst [vmem:[%s931_s26 + $0x20] sm:$0xff] %v595_v3  ;;  %v601_v9 = vpop.eup %600  ;;  %612 = vtanh.f32 %v167_v16  ;;  %v187_v56 = vld [vmem:[%s921_s28 + $0xe8] sm:$0xff]  ;;  %v188_v58 = vld [vmem:[%s921_s28 + $0xf0] sm:$0xff]  ;;  %v189_v60 = vld [vmem:[%s921_s28 + $0xf8] sm:$0xff] }
  0x4f   : > { %378 = vst [vmem:[%s931_s26 + $0x30] sm:$0xff] %v595_v3  ;;  %v603_v11 = vpop.eup %602  ;;  %614 = vtanh.f32 %v168_v18  ;;  %v190_v62 = vld [vmem:[%s921_s28 + $0x100] sm:$0xff]  ;;  %v191_v0 = vld [vmem:[%s921_s28 + $0x108] sm:$0xff]  ;;  %v192_v2 = vld [vmem:[%s921_s28 + $0x110] sm:$0xff] }
  0x50   : > { %247 = vst [vmem:[%s931_s26 + $0x8] sm:$0xff] %v597_v5  ;;  %v605_v13 = vpop.eup %604  ;;  %616 = vtanh.f32 %v169_v20  ;;  %v193_v4 = vld [vmem:[%s921_s28 + $0x118] sm:$0xff]  ;;  %v194_v6 = vld [vmem:[%s921_s28 + $0x120] sm:$0xff]  ;;  %v195_v8 = vld [vmem:[%s921_s28 + $0x128] sm:$0xff] }
  0x51   : > { %291 = vst [vmem:[%s931_s26 + $0x18] sm:$0xff] %v597_v5  ;;  %v607_v15 = vpop.eup %606  ;;  %618 = vtanh.f32 %v170_v22  ;;  %v196_v10 = vld [vmem:[%s921_s28 + $0x130] sm:$0xff]  ;;  %v197_v12 = vld [vmem:[%s921_s28 + $0x138] sm:$0xff]  ;;  %v198_v14 = vld [vmem:[%s921_s28 + $0x140] sm:$0xff] }
  0x52   : > { %335 = vst [vmem:[%s931_s26 + $0x28] sm:$0xff] %v597_v5  ;;  %v609_v17 = vpop.eup %608  ;;  %620 = vtanh.f32 %v171_v24  ;;  %v199_v16 = vld [vmem:[%s921_s28 + $0x148] sm:$0xff]  ;;  %v200_v18 = vld [vmem:[%s921_s28 + $0x150] sm:$0xff]  ;;  %v201_v20 = vld [vmem:[%s921_s28 + $0x158] sm:$0xff] }
  0x53   : > { %379 = vst [vmem:[%s931_s26 + $0x38] sm:$0xff] %v597_v5  ;;  %v611_v19 = vpop.eup %610  ;;  %622 = vtanh.f32 %v172_v26 }
  0x54   : > { %248 = vst [vmem:[%s931_s26 + $0x40] sm:$0xff] %v599_v7  ;;  %v613_v21 = vpop.eup %612  ;;  %624 = vtanh.f32 %v173_v28 }
  0x55   : > { %292 = vst [vmem:[%s931_s26 + $0x50] sm:$0xff] %v599_v7  ;;  %v615_v23 = vpop.eup %614  ;;  %626 = vtanh.f32 %v174_v30 }
  0x56   : > { %336 = vst [vmem:[%s931_s26 + $0x60] sm:$0xff] %v599_v7  ;;  %v617_v25 = vpop.eup %616  ;;  %628 = vtanh.f32 %v175_v32 }
  0x57   : > { %380 = vst [vmem:[%s931_s26 + $0x70] sm:$0xff] %v599_v7  ;;  %v619_v27 = vpop.eup %618  ;;  %630 = vtanh.f32 %v176_v34 }
  0x58   : > { %249 = vst [vmem:[%s931_s26 + $0x48] sm:$0xff] %v601_v9  ;;  %v621_v29 = vpop.eup %620  ;;  %632 = vtanh.f32 %v177_v36 }
  0x59   : > { %293 = vst [vmem:[%s931_s26 + $0x58] sm:$0xff] %v601_v9  ;;  %v623_v31 = vpop.eup %622  ;;  %634 = vtanh.f32 %v178_v38 }
  0x5a   : > { %337 = vst [vmem:[%s931_s26 + $0x68] sm:$0xff] %v601_v9  ;;  %v625_v33 = vpop.eup %624  ;;  %636 = vtanh.f32 %v179_v40 }
  0x5b   : > { %381 = vst [vmem:[%s931_s26 + $0x78] sm:$0xff] %v601_v9  ;;  %v627_v35 = vpop.eup %626  ;;  %638 = vtanh.f32 %v180_v42 }
  0x5c   : > { %250 = vst [vmem:[%s931_s26 + $0x80] sm:$0xff] %v603_v11  ;;  %v629_v37 = vpop.eup %628  ;;  %640 = vtanh.f32 %v181_v44 }
  0x5d   : > { %294 = vst [vmem:[%s931_s26 + $0x90] sm:$0xff] %v603_v11  ;;  %v631_v39 = vpop.eup %630  ;;  %642 = vtanh.f32 %v182_v46 }
  0x5e   : > { %338 = vst [vmem:[%s931_s26 + $0xa0] sm:$0xff] %v603_v11  ;;  %v633_v41 = vpop.eup %632  ;;  %644 = vtanh.f32 %v183_v48 }
  0x5f   : > { %382 = vst [vmem:[%s931_s26 + $0xb0] sm:$0xff] %v603_v11  ;;  %v635_v43 = vpop.eup %634  ;;  %646 = vtanh.f32 %v184_v50 }
  0x60   : > { %251 = vst [vmem:[%s931_s26 + $0x88] sm:$0xff] %v605_v13  ;;  %v637_v45 = vpop.eup %636  ;;  %648 = vtanh.f32 %v185_v52 }
  0x61   : > { %295 = vst [vmem:[%s931_s26 + $0x98] sm:$0xff] %v605_v13  ;;  %v639_v47 = vpop.eup %638  ;;  %650 = vtanh.f32 %v186_v54 }
  0x62   : > { %339 = vst [vmem:[%s931_s26 + $0xa8] sm:$0xff] %v605_v13  ;;  %v641_v49 = vpop.eup %640  ;;  %652 = vtanh.f32 %v187_v56 }
  0x63   : > { %383 = vst [vmem:[%s931_s26 + $0xb8] sm:$0xff] %v605_v13  ;;  %v643_v51 = vpop.eup %642  ;;  %654 = vtanh.f32 %v188_v58 }
  0x64   : > { %252 = vst [vmem:[%s931_s26 + $0xc0] sm:$0xff] %v607_v15  ;;  %v645_v53 = vpop.eup %644  ;;  %656 = vtanh.f32 %v189_v60 }
  0x65   : > { %296 = vst [vmem:[%s931_s26 + $0xd0] sm:$0xff] %v607_v15  ;;  %v647_v55 = vpop.eup %646  ;;  %658 = vtanh.f32 %v190_v62 }
  0x66   : > { %340 = vst [vmem:[%s931_s26 + $0xe0] sm:$0xff] %v607_v15  ;;  %v649_v57 = vpop.eup %648  ;;  %660 = vtanh.f32 %v191_v0 }
  0x67   : > { %384 = vst [vmem:[%s931_s26 + $0xf0] sm:$0xff] %v607_v15  ;;  %v651_v59 = vpop.eup %650  ;;  %662 = vtanh.f32 %v192_v2 }
  0x68   : > { %253 = vst [vmem:[%s931_s26 + $0xc8] sm:$0xff] %v609_v17  ;;  %v653_v61 = vpop.eup %652  ;;  %664 = vtanh.f32 %v193_v4 }
  0x69   : > { %297 = vst [vmem:[%s931_s26 + $0xd8] sm:$0xff] %v609_v17  ;;  %v655_v63 = vpop.eup %654  ;;  %666 = vtanh.f32 %v194_v6 }
  0x6a   : > { %341 = vst [vmem:[%s931_s26 + $0xe8] sm:$0xff] %v609_v17  ;;  %v657_v1 = vpop.eup %656  ;;  %668 = vtanh.f32 %v195_v8 }
  0x6b   : > { %385 = vst [vmem:[%s931_s26 + $0xf8] sm:$0xff] %v609_v17  ;;  %v659_v3 = vpop.eup %658  ;;  %670 = vtanh.f32 %v196_v10 }
  0x6c   : > { %254 = vst [vmem:[%s931_s26 + $0x100] sm:$0xff] %v611_v19  ;;  %v661_v5 = vpop.eup %660  ;;  %672 = vtanh.f32 %v197_v12 }
  0x6d   : > { %298 = vst [vmem:[%s931_s26 + $0x110] sm:$0xff] %v611_v19  ;;  %v663_v7 = vpop.eup %662  ;;  %674 = vtanh.f32 %v198_v14 }
  0x6e   : > { %342 = vst [vmem:[%s931_s26 + $0x120] sm:$0xff] %v611_v19  ;;  %v665_v9 = vpop.eup %664  ;;  %676 = vtanh.f32 %v199_v16 }
  0x6f   : > { %386 = vst [vmem:[%s931_s26 + $0x130] sm:$0xff] %v611_v19  ;;  %v667_v11 = vpop.eup %666  ;;  %678 = vtanh.f32 %v200_v18 }
  0x70   : > { %255 = vst [vmem:[%s931_s26 + $0x108] sm:$0xff] %v613_v21  ;;  %v669_v13 = vpop.eup %668  ;;  %680 = vtanh.f32 %v201_v20 }
  0x71   : > { %299 = vst [vmem:[%s931_s26 + $0x118] sm:$0xff] %v613_v21  ;;  %v671_v15 = vpop.eup %670 }
  0x72   : > { %343 = vst [vmem:[%s931_s26 + $0x128] sm:$0xff] %v613_v21  ;;  %v673_v17 = vpop.eup %672 }
  0x73   : > { %387 = vst [vmem:[%s931_s26 + $0x138] sm:$0xff] %v613_v21  ;;  %v675_v19 = vpop.eup %674 }
  0x74   : > { %256 = vst [vmem:[%s931_s26 + $0x140] sm:$0xff] %v615_v23  ;;  %v677_v21 = vpop.eup %676 }
  0x75   : > { %300 = vst [vmem:[%s931_s26 + $0x150] sm:$0xff] %v615_v23  ;;  %v679_v22 = vpop.eup %678 }
  0x76   : > { %344 = vst [vmem:[%s931_s26 + $0x160] sm:$0xff] %v615_v23 }
  0x77   : > { %388 = vst [vmem:[%s931_s26 + $0x170] sm:$0xff] %v615_v23  ;;  %v681_v23 = vpop.eup %680 }
  0x78   : > { %257 = vst [vmem:[%s931_s26 + $0x148] sm:$0xff] %v617_v25 }
  0x79   : > { %301 = vst [vmem:[%s931_s26 + $0x158] sm:$0xff] %v617_v25 }
  0x7a   : > { %345 = vst [vmem:[%s931_s26 + $0x168] sm:$0xff] %v617_v25 }
  0x7b   : > { %389 = vst [vmem:[%s931_s26 + $0x178] sm:$0xff] %v617_v25 }
  0x7c   : > { %258 = vst [vmem:[%s931_s26 + $0x180] sm:$0xff] %v619_v27 }
  0x7d   : > { %302 = vst [vmem:[%s931_s26 + $0x190] sm:$0xff] %v619_v27 }
  0x7e   : > { %346 = vst [vmem:[%s931_s26 + $0x1a0] sm:$0xff] %v619_v27 }
  0x7f   : > { %390 = vst [vmem:[%s931_s26 + $0x1b0] sm:$0xff] %v619_v27 }
  0x80   : > { %259 = vst [vmem:[%s931_s26 + $0x188] sm:$0xff] %v621_v29 }
  0x81   : > { %303 = vst [vmem:[%s931_s26 + $0x198] sm:$0xff] %v621_v29 }
  0x82   : > { %347 = vst [vmem:[%s931_s26 + $0x1a8] sm:$0xff] %v621_v29 }
  0x83   : > { %391 = vst [vmem:[%s931_s26 + $0x1b8] sm:$0xff] %v621_v29 }
  0x84   : > { %260 = vst [vmem:[%s931_s26 + $0x1c0] sm:$0xff] %v623_v31 }
  0x85   : > { %304 = vst [vmem:[%s931_s26 + $0x1d0] sm:$0xff] %v623_v31 }
  0x86   : > { %348 = vst [vmem:[%s931_s26 + $0x1e0] sm:$0xff] %v623_v31 }
  0x87   : > { %392 = vst [vmem:[%s931_s26 + $0x1f0] sm:$0xff] %v623_v31 }
  0x88   : > { %261 = vst [vmem:[%s931_s26 + $0x1c8] sm:$0xff] %v625_v33 }
  0x89   : > { %305 = vst [vmem:[%s931_s26 + $0x1d8] sm:$0xff] %v625_v33 }
  0x8a   : > { %349 = vst [vmem:[%s931_s26 + $0x1e8] sm:$0xff] %v625_v33 }
  0x8b   : > { %393 = vst [vmem:[%s931_s26 + $0x1f8] sm:$0xff] %v625_v33 }
  0x8c   : > { %262 = vst [vmem:[%s931_s26 + $0x200] sm:$0xff] %v627_v35 }
  0x8d   : > { %306 = vst [vmem:[%s931_s26 + $0x210] sm:$0xff] %v627_v35 }
  0x8e   : > { %350 = vst [vmem:[%s931_s26 + $0x220] sm:$0xff] %v627_v35 }
  0x8f   : > { %394 = vst [vmem:[%s931_s26 + $0x230] sm:$0xff] %v627_v35 }
  0x90   : > { %263 = vst [vmem:[%s931_s26 + $0x208] sm:$0xff] %v629_v37 }
  0x91   : > { %307 = vst [vmem:[%s931_s26 + $0x218] sm:$0xff] %v629_v37 }
  0x92   : > { %351 = vst [vmem:[%s931_s26 + $0x228] sm:$0xff] %v629_v37 }
  0x93   : > { %395 = vst [vmem:[%s931_s26 + $0x238] sm:$0xff] %v629_v37 }
  0x94   : > { %264 = vst [vmem:[%s931_s26 + $0x240] sm:$0xff] %v631_v39 }
  0x95   : > { %308 = vst [vmem:[%s931_s26 + $0x250] sm:$0xff] %v631_v39 }
  0x96   : > { %352 = vst [vmem:[%s931_s26 + $0x260] sm:$0xff] %v631_v39 }
  0x97   : > { %396 = vst [vmem:[%s931_s26 + $0x270] sm:$0xff] %v631_v39 }
  0x98   : > { %265 = vst [vmem:[%s931_s26 + $0x248] sm:$0xff] %v633_v41 }
  0x99   : > { %309 = vst [vmem:[%s931_s26 + $0x258] sm:$0xff] %v633_v41 }
  0x9a   : > { %353 = vst [vmem:[%s931_s26 + $0x268] sm:$0xff] %v633_v41 }
  0x9b   : > { %397 = vst [vmem:[%s931_s26 + $0x278] sm:$0xff] %v633_v41 }
  0x9c   : > { %266 = vst [vmem:[%s931_s26 + $0x280] sm:$0xff] %v635_v43 }
  0x9d   : > { %310 = vst [vmem:[%s931_s26 + $0x290] sm:$0xff] %v635_v43 }
  0x9e   : > { %354 = vst [vmem:[%s931_s26 + $0x2a0] sm:$0xff] %v635_v43 }
  0x9f   : > { %398 = vst [vmem:[%s931_s26 + $0x2b0] sm:$0xff] %v635_v43 }
  0xa0   : > { %267 = vst [vmem:[%s931_s26 + $0x288] sm:$0xff] %v637_v45 }
  0xa1   : > { %311 = vst [vmem:[%s931_s26 + $0x298] sm:$0xff] %v637_v45 }
  0xa2   : > { %355 = vst [vmem:[%s931_s26 + $0x2a8] sm:$0xff] %v637_v45 }
  0xa3   : > { %399 = vst [vmem:[%s931_s26 + $0x2b8] sm:$0xff] %v637_v45 }
  0xa4   : > { %268 = vst [vmem:[%s931_s26 + $0x2c0] sm:$0xff] %v639_v47 }
  0xa5   : > { %312 = vst [vmem:[%s931_s26 + $0x2d0] sm:$0xff] %v639_v47 }
  0xa6   : > { %356 = vst [vmem:[%s931_s26 + $0x2e0] sm:$0xff] %v639_v47 }
  0xa7   : > { %400 = vst [vmem:[%s931_s26 + $0x2f0] sm:$0xff] %v639_v47 }
  0xa8   : > { %269 = vst [vmem:[%s931_s26 + $0x2c8] sm:$0xff] %v641_v49 }
  0xa9   : > { %313 = vst [vmem:[%s931_s26 + $0x2d8] sm:$0xff] %v641_v49 }
  0xaa   : > { %357 = vst [vmem:[%s931_s26 + $0x2e8] sm:$0xff] %v641_v49 }
  0xab   : > { %401 = vst [vmem:[%s931_s26 + $0x2f8] sm:$0xff] %v641_v49 }
  0xac   : > { %270 = vst [vmem:[%s931_s26 + $0x300] sm:$0xff] %v643_v51 }
  0xad   : > { %314 = vst [vmem:[%s931_s26 + $0x310] sm:$0xff] %v643_v51 }
  0xae   : > { %358 = vst [vmem:[%s931_s26 + $0x320] sm:$0xff] %v643_v51 }
  0xaf   : > { %402 = vst [vmem:[%s931_s26 + $0x330] sm:$0xff] %v643_v51 }
  0xb0   : > { %271 = vst [vmem:[%s931_s26 + $0x308] sm:$0xff] %v645_v53 }
  0xb1   : > { %315 = vst [vmem:[%s931_s26 + $0x318] sm:$0xff] %v645_v53 }
  0xb2   : > { %359 = vst [vmem:[%s931_s26 + $0x328] sm:$0xff] %v645_v53 }
  0xb3   : > { %403 = vst [vmem:[%s931_s26 + $0x338] sm:$0xff] %v645_v53 }
  0xb4   : > { %272 = vst [vmem:[%s931_s26 + $0x340] sm:$0xff] %v647_v55 }
  0xb5   : > { %316 = vst [vmem:[%s931_s26 + $0x350] sm:$0xff] %v647_v55 }
  0xb6   : > { %360 = vst [vmem:[%s931_s26 + $0x360] sm:$0xff] %v647_v55 }
  0xb7   : > { %404 = vst [vmem:[%s931_s26 + $0x370] sm:$0xff] %v647_v55 }
  0xb8   : > { %273 = vst [vmem:[%s931_s26 + $0x348] sm:$0xff] %v649_v57 }
  0xb9   : > { %317 = vst [vmem:[%s931_s26 + $0x358] sm:$0xff] %v649_v57 }
  0xba   : > { %361 = vst [vmem:[%s931_s26 + $0x368] sm:$0xff] %v649_v57 }
  0xbb   : > { %405 = vst [vmem:[%s931_s26 + $0x378] sm:$0xff] %v649_v57 }
  0xbc   : > { %274 = vst [vmem:[%s931_s26 + $0x380] sm:$0xff] %v651_v59 }
  0xbd   : > { %318 = vst [vmem:[%s931_s26 + $0x390] sm:$0xff] %v651_v59 }
  0xbe   : > { %362 = vst [vmem:[%s931_s26 + $0x3a0] sm:$0xff] %v651_v59 }
  0xbf   : > { %406 = vst [vmem:[%s931_s26 + $0x3b0] sm:$0xff] %v651_v59 }
  0xc0   : > { %275 = vst [vmem:[%s931_s26 + $0x388] sm:$0xff] %v653_v61 }
  0xc1   : > { %319 = vst [vmem:[%s931_s26 + $0x398] sm:$0xff] %v653_v61 }
  0xc2   : > { %363 = vst [vmem:[%s931_s26 + $0x3a8] sm:$0xff] %v653_v61 }
  0xc3   : > { %407 = vst [vmem:[%s931_s26 + $0x3b8] sm:$0xff] %v653_v61 }
  0xc4   : > { %276 = vst [vmem:[%s931_s26 + $0x3c0] sm:$0xff] %v655_v63 }
  0xc5   : > { %320 = vst [vmem:[%s931_s26 + $0x3d0] sm:$0xff] %v655_v63 }
  0xc6   : > { %364 = vst [vmem:[%s931_s26 + $0x3e0] sm:$0xff] %v655_v63 }
  0xc7   : > { %408 = vst [vmem:[%s931_s26 + $0x3f0] sm:$0xff] %v655_v63 }
  0xc8   : > { %277 = vst [vmem:[%s931_s26 + $0x3c8] sm:$0xff] %v657_v1 }
  0xc9   : > { %321 = vst [vmem:[%s931_s26 + $0x3d8] sm:$0xff] %v657_v1 }
  0xca   : > { %365 = vst [vmem:[%s931_s26 + $0x3e8] sm:$0xff] %v657_v1 }
  0xcb   : > { %409 = vst [vmem:[%s931_s26 + $0x3f8] sm:$0xff] %v657_v1 }
  0xcc   : > { %278 = vst [vmem:[%s931_s26 + $0x400] sm:$0xff] %v659_v3 }
  0xcd   : > { %322 = vst [vmem:[%s931_s26 + $0x410] sm:$0xff] %v659_v3 }
  0xce   : > { %366 = vst [vmem:[%s931_s26 + $0x420] sm:$0xff] %v659_v3 }
  0xcf   : > { %410 = vst [vmem:[%s931_s26 + $0x430] sm:$0xff] %v659_v3 }
  0xd0   : > { %279 = vst [vmem:[%s931_s26 + $0x408] sm:$0xff] %v661_v5 }
  0xd1   : > { %323 = vst [vmem:[%s931_s26 + $0x418] sm:$0xff] %v661_v5 }
  0xd2   : > { %367 = vst [vmem:[%s931_s26 + $0x428] sm:$0xff] %v661_v5 }
  0xd3   : > { %411 = vst [vmem:[%s931_s26 + $0x438] sm:$0xff] %v661_v5 }
  0xd4   : > { %280 = vst [vmem:[%s931_s26 + $0x440] sm:$0xff] %v663_v7 }
  0xd5   : > { %324 = vst [vmem:[%s931_s26 + $0x450] sm:$0xff] %v663_v7 }
  0xd6   : > { %368 = vst [vmem:[%s931_s26 + $0x460] sm:$0xff] %v663_v7 }
  0xd7   : > { %412 = vst [vmem:[%s931_s26 + $0x470] sm:$0xff] %v663_v7 }
  0xd8   : > { %281 = vst [vmem:[%s931_s26 + $0x448] sm:$0xff] %v665_v9 }
  0xd9   : > { %325 = vst [vmem:[%s931_s26 + $0x458] sm:$0xff] %v665_v9 }
  0xda   : > { %369 = vst [vmem:[%s931_s26 + $0x468] sm:$0xff] %v665_v9 }
  0xdb   : > { %413 = vst [vmem:[%s931_s26 + $0x478] sm:$0xff] %v665_v9 }
  0xdc   : > { %282 = vst [vmem:[%s931_s26 + $0x480] sm:$0xff] %v667_v11 }
  0xdd   : > { %326 = vst [vmem:[%s931_s26 + $0x490] sm:$0xff] %v667_v11 }
  0xde   : > { %370 = vst [vmem:[%s931_s26 + $0x4a0] sm:$0xff] %v667_v11 }
  0xdf   : > { %414 = vst [vmem:[%s931_s26 + $0x4b0] sm:$0xff] %v667_v11 }
  0xe0   : > { %283 = vst [vmem:[%s931_s26 + $0x488] sm:$0xff] %v669_v13 }
  0xe1   : > { %327 = vst [vmem:[%s931_s26 + $0x498] sm:$0xff] %v669_v13 }
  0xe2   : > { %371 = vst [vmem:[%s931_s26 + $0x4a8] sm:$0xff] %v669_v13 }
  0xe3   : > { %415 = vst [vmem:[%s931_s26 + $0x4b8] sm:$0xff] %v669_v13 }
  0xe4   : > { %284 = vst [vmem:[%s931_s26 + $0x4c0] sm:$0xff] %v671_v15 }
  0xe5   : > { %328 = vst [vmem:[%s931_s26 + $0x4d0] sm:$0xff] %v671_v15 }
  0xe6   : > { %372 = vst [vmem:[%s931_s26 + $0x4e0] sm:$0xff] %v671_v15 }
  0xe7   : > { %416 = vst [vmem:[%s931_s26 + $0x4f0] sm:$0xff] %v671_v15 }
  0xe8   : > { %285 = vst [vmem:[%s931_s26 + $0x4c8] sm:$0xff] %v673_v17 }
  0xe9   : > { %329 = vst [vmem:[%s931_s26 + $0x4d8] sm:$0xff] %v673_v17 }
  0xea   : > { %373 = vst [vmem:[%s931_s26 + $0x4e8] sm:$0xff] %v673_v17 }
  0xeb   : > { %417 = vst [vmem:[%s931_s26 + $0x4f8] sm:$0xff] %v673_v17 }
  0xec   : > { %286 = vst [vmem:[%s931_s26 + $0x500] sm:$0xff] %v675_v19 }
  0xed   : > { %330 = vst [vmem:[%s931_s26 + $0x510] sm:$0xff] %v675_v19 }
  0xee   : > { %374 = vst [vmem:[%s931_s26 + $0x520] sm:$0xff] %v675_v19 }
  0xef   : > { %418 = vst [vmem:[%s931_s26 + $0x530] sm:$0xff] %v675_v19 }
  0xf0   : > { %287 = vst [vmem:[%s931_s26 + $0x508] sm:$0xff] %v677_v21 }
  0xf1   : > { %331 = vst [vmem:[%s931_s26 + $0x518] sm:$0xff] %v677_v21 }
  0xf2   : > { %375 = vst [vmem:[%s931_s26 + $0x528] sm:$0xff] %v677_v21 }
  0xf3   : > { %419 = vst [vmem:[%s931_s26 + $0x538] sm:$0xff] %v677_v21 }
  0xf4   : > { %288 = vst [vmem:[%s931_s26 + $0x540] sm:$0xff] %v679_v22 }
  0xf5   : > { %332 = vst [vmem:[%s931_s26 + $0x550] sm:$0xff] %v679_v22 }
  0xf6   : > { %376 = vst [vmem:[%s931_s26 + $0x560] sm:$0xff] %v679_v22 }
  0xf7   : > { %420 = vst [vmem:[%s931_s26 + $0x570] sm:$0xff] %v679_v22  ;;  %429 = sbr.rel (!%p860_p9) target bundleno = 283 (0x11b), region = 32 }
  0xf8   : > { %289 = vst [vmem:[%s931_s26 + $0x548] sm:$0xff] %v681_v23 }
  0xf9   : > { %333 = vst [vmem:[%s931_s26 + $0x558] sm:$0xff] %v681_v23 }
  0xfa   : > { %377 = vst [vmem:[%s931_s26 + $0x568] sm:$0xff] %v681_v23 }
  0xfb   : > { %421 = vst [vmem:[%s931_s26 + $0x578] sm:$0xff] %v681_v23 }
  0xfc   : > { %s1226_s2 = smov (!%p432_p6, %s431_s2), 22 }
  0xfd   : > { %s543_s11 = sshll.u32 %s1226_s2, 6 }
  0xfe   : > { %s436_s21 = ssub.s32 1408, %s543_s11 }
  0xff   : > { %s437_s23 = sshll.u32 %s436_s21, 4 }
 0x100   : > { %438 = vsyncadd %s423_s16, %s437_s23  ;;  %p1159_p13 = scmp.ne.s32.totalorder %s543_s11, 0  ;;  %s547_s24 = smul.u32 1408, %s837_s10 }
 0x101   : > { %s444_s25 = sshll.u32 %s931_s26, 4  ;;  %s537_s27 = sshll.u32 %s1226_s2, 10  ;;  %s1169_s25 = int_to_ptr.vmem [resolvable:$true] %s444_s25 }
 0x102   : > { %s442_s4 = scalar_lea.hbm %s1213_s1, %s547_s24  ;;  %s721_s13 = sshra.s32 %s1169_s25, 4  ;;  %s722_s13 = int_to_ptr.vmem [resolvable:$true] %s721_s13 }
 0x103   : > { %s446_s5 = sshll.u32 %s442_s4, 4  ;;  %s723_s19 = sshrl.u32 %s537_s27, 4  ;;  %s1171_s5 = int_to_ptr.hbm [resolvable:$true] %s446_s5 }
 0x104   : > { %s728_s20 = scalar_lea.vmem %s722_s13, %s723_s19  ;;  %s803_s10 = smov [#allocation5]  }
 0x105   : > { %p729_p9 = scmp.ne.s32.totalorder %s722_s13, %s728_s20  ;;  %s732_s28 = scalar_lea.vmem %s803_s10, 2816 }
 0x106   : > { %p734_p8 = scmp.lt.s32.totalorder %s732_s28, %s728_s20 }
 0x107   : > { %p730_p5 = pnand %p729_p9, %p1159_p13 }
 0x109   : > { %p731_p7 = pneg %p730_p5 }
 0x10b   : > { %p736_p11 = pnand %p734_p8, %p731_p7 }
 0x10d   : > { %739 = shalt.err (!%p736_p11)
}
 0x10e   : > { %s740_s22 = sshra.s32 %s1171_s5, 4  ;;  %s751_s21 = scalar_lea.hbm %s1213_s1, 16384  ;;  %s741_s22 = int_to_ptr.hbm [resolvable:$true] %s740_s22 }
 0x10f   : > { %s747_s26 = scalar_lea.hbm %s741_s22, %s723_s19  ;;  %p752_p2 = scmp.lt.s32.totalorder %s741_s22, %s1213_s1 }
 0x110   : > { %p748_p12 = scmp.ne.s32.totalorder %s741_s22, %s747_s26  ;;  %p753_p3 = scmp.lt.s32.totalorder %s751_s21, %s747_s26 }
 0x112   : > { %p749_p0 = pnand %p748_p12, %p1159_p13  ;;  %p754_p4 = por %p753_p3, %p752_p2 }
 0x114   : > { %p750_p1 = pneg %p749_p0 }
 0x116   : > { %p755_p6 = pnand %p754_p4, %p750_p1 }
 0x118   : > { %758 = shalt.err (!%p755_p6)
}
 0x119   : > { %s804_s29 = smov 1024   ;;  %s805_s3 = smov 64  }
 0x11a   : > { %452 = dma.vmem_to_hbm [thread:$0]  (%p1159_p13), %s1169_s25, %s537_s27, %s1171_s5, %s423_s16, %s804_s29, %s804_s29, %s805_s3  }
 0x11b PF: > { %p557_p9 = scmp.ge.s32.totalorder %s798_s9, 2  ;;  %s461_s4 = sand.u32 1, %s786_s6  }
 0x11c   : > { %s462_s13 = scalar_lea.sflag [#allocation4], %s461_s4 }
 0x11d   : > { %p554_p5 = pnand %p557_p9, %p864_p10 }
 0x11f   : > { %p555_p7 = pneg %p554_p5 }
 0x121   : > { %781 = dma.done.wait (%p555_p7), %s462_s13, 22528  }
 0x122   : > { %783 = vsyncadd (%p555_p7), %s462_s13, 4294944768  ;;  %p14_p8 = scmp.ge.s32.totalorder %s841_s12, 14   ;;  %s1219_s6 = smov %s790_s7 }
 0x123   : > { %s1220_s7 = smov %s794_s8  ;;  %s1221_s8 = smov %s853_s15 }
 0x124   : > { %s1222_s9 = smov %s841_s12  ;;  %16 = sbr.rel (!%p14_p8) target bundleno = 5 (0x5), region = 69 }
 0x129   :  { %468 = vsyncpa [#allocation3], 1 }
 0x12a   :  { %470 = vsyncpa [#allocation3 + $0x1], 1 }
 0x12b   :  { %471 = vsyncpa [#allocation4], 1 }
 0x12c   :  { %473 = vsyncpa [#allocation4 + $0x1], 1 }

</bundles_post_ra>
